<compile_context>
chip_gen: v7x
topology: tpu7x:2x2x1
jax: 0.10.0
libtpu: 0.0.40
codegen_flags: <defaults>
</compile_context>

<pallas_src>
import functools

import jax
import jax.numpy as jnp
import numpy as np
from jax.experimental import pallas as pl
from jax.experimental.pallas import tpu as pltpu

ALPHA = 0.01      # LeakyReLU negative slope
BN_EPS = 1e-5     # nn.BatchNorm1d default eps
_ALIGN = 16       # bf16 native sublane tile -> keep slab sections sublane-aligned


def _round_up(n, m):
    return ((n + m - 1) // m) * m


def _leaky(h):
    return jnp.where(h > 0, h, ALPHA * h)


def _bn_train(h, gamma, beta):
    # training-mode BatchNorm1d: batch mean / biased batch variance; reuse (h - mu).
    mu = jnp.mean(h, axis=0, keepdims=True)
    d = h - mu
    var = jnp.mean(d * d, axis=0, keepdims=True)
    return d * jax.lax.rsqrt(var + BN_EPS) * gamma + beta


def _dot(a, w_bf16):
    # MXU is bf16-native; keep accumulation in f32.
    return jnp.dot(a.astype(jnp.bfloat16), w_bf16, preferred_element_type=jnp.float32)


def _make_kernel(S, C, L, H, offs):
    o_ew1, o_ew2, o_dw1z, o_dw1c, o_dw2, o_head = offs

    def kernel(inp_ref, wmat_ref, vec_ref, out_ref):
        # ---- unpack packed operands (static slices: free) ----
        inp = inp_ref[...]                             # (B, S+C+L) f32 = [x | c | eps]
        xc = inp[:, : S + C]
        c = inp[:, S: S + C]
        eps = inp[:, S + C: S + C + L]

        vec = vec_ref[...]                             # (13, H) f32 row-vector slab
        eb1, eg1, ebe1 = vec[0:1], vec[1:2], vec[2:3]
        eb2, eg2, ebe2 = vec[3:4], vec[4:5], vec[5:6]
        db1, dg1, dbe1 = vec[6:7], vec[7:8], vec[8:9]
        db2, dg2, dbe2 = vec[9:10], vec[10:11], vec[11:12]
        head_b = vec[12:13]                            # lanes [0:2L]=ebm|ebv, [2L:2L+S]=dbo

        ew1 = wmat_ref[o_ew1:o_ew1 + S + C, :]         # (S+C, H) bf16  (fc1 of encoder)
        ew2 = wmat_ref[o_ew2:o_ew2 + H, :]             # (H, H)
        dw1z = wmat_ref[o_dw1z:o_dw1z + L, :]          # (L, H)
        dw1c = wmat_ref[o_dw1c:o_dw1c + C, :]          # (C, H)
        dw2 = wmat_ref[o_dw2:o_dw2 + H, :]             # (H, H)
        whead = wmat_ref[o_head:o_head + H, :]         # (H, H): lanes [0:2L]=ewm|ewv,
                                                       #         lanes [2L:2L+S]=dwo, rest 0

        # ---- Encoder ----
        h = _dot(xc, ew1) + eb1
        h = _leaky(_bn_train(h, eg1, ebe1))
        h = _dot(h, ew2) + eb2
        h = _leaky(_bn_train(h, eg2, ebe2))
        enc_head = _dot(h, whead) + head_b             # (B, H); lanes [0:2L] meaningful
        ml = jnp.tanh(enc_head[:, : 2 * L])            # [mean | logvar]
        mean = ml[:, :L]
        logvar = ml[:, L:]

        # ---- Reparameterization (f32 elementwise) ----
        z = mean + eps * jnp.exp(0.5 * logvar)

        # ---- Decoder ----
        g = _dot(z, dw1z) + _dot(c, dw1c) + db1        # cat([z,c]) realised as split matmul
        g = _leaky(_bn_train(g, dg1, dbe1))
        g = _dot(g, dw2) + db2
        g = _leaky(_bn_train(g, dg2, dbe2))
        dec_head = _dot(g, whead) + head_b             # lanes [2L:2L+S] meaningful
        next_state = jnp.tanh(dec_head[:, 2 * L: 2 * L + S])

        # one lane-packed output: [next_state | mean | logvar]
        out_ref[...] = jnp.concatenate([next_state, ml], axis=1)

    return kernel


def _pack_params(p, S, C, L, H):
    """Pack 24 tiny params into one bf16 matrix slab + one f32 row-vector slab."""
    assert 2 * L + S <= H
    head_w = jnp.concatenate([p["ewm"], p["ewv"], p["dwo"]], axis=1)     # (H, 2L+S)
    head_w = jnp.pad(head_w, ((0, 0), (0, H - (2 * L + S))))             # pad lanes to H
    sections = [
        jnp.concatenate([p["ew1x"], p["ew1c"]], axis=0),                 # ew1  (S+C, H)
        p["ew2"],                                                        # (H, H)
        p["dw1z"],                                                       # (L, H)
        p["dw1c"],                                                       # (C, H)
        p["dw2"],                                                        # (H, H)
        head_w,                                                          # (H, H)
    ]
    offs, blocks, rows = [], [], 0
    for a in sections:
        start = _round_up(rows, _ALIGN)
        if start > rows:
            blocks.append(jnp.zeros((start - rows, H), jnp.float32))
        offs.append(start)
        blocks.append(a.astype(jnp.float32))
        rows = start + a.shape[0]
    end = _round_up(rows, _ALIGN)
    if end > rows:
        blocks.append(jnp.zeros((end - rows, H), jnp.float32))
    wmat = jnp.concatenate(blocks, axis=0).astype(jnp.bfloat16)          # (R, H) bf16

    head_b = jnp.concatenate([p["ebm"], p["ebv"], p["dbo"]], axis=1)     # (1, 2L+S)
    head_b = jnp.pad(head_b, ((0, 0), (0, H - (2 * L + S))))
    vec = jnp.concatenate([
        p["eb1"], p["eg1"], p["ebe1"],
        p["eb2"], p["eg2"], p["ebe2"],
        p["db1"], p["dg1"], p["dbe1"],
        p["db2"], p["dg2"], p["dbe2"],
        head_b,
    ], axis=0).astype(jnp.float32)                                       # (13, H) f32
    return wmat, vec, tuple(offs)


@jax.jit
def cvae_forward(x, c, eps, params):
    """Pallas implementation of CVAE.forward(x, c, device) (eps = torch.randn noise)."""
    B, S = x.shape
    C = c.shape[1]
    L = eps.shape[1]
    H = params["ew2"].shape[0]

    wmat, vec, offs = _pack_params(params, S, C, L, H)
    inp = jnp.concatenate([x, c, eps], axis=1).astype(jnp.float32)       # (B, S+C+L)

    out_w = S + 2 * L
    kernel = _make_kernel(S, C, L, H, offs)
    vmem = pl.BlockSpec(memory_space=pltpu.MemorySpace.VMEM)

    # Advisory cost estimate (7 tiny matmuls + elementwise) for XLA scheduling.
    flops = 2 * B * H * ((S + C) + H + H + L + C + H + H) + 40 * B * H
    transcendentals = B * (3 * L + S) + 4 * H
    bytes_accessed = int(inp.size * 4 + wmat.size * 2 + vec.size * 4 + B * out_w * 4)

    out = pl.pallas_call(
        kernel,
        out_shape=jax.ShapeDtypeStruct((B, out_w), jnp.float32),
        in_specs=[vmem, vmem, vmem],
        out_specs=vmem,
        cost_estimate=pl.CostEstimate(
            flops=flops,
            transcendentals=transcendentals,
            bytes_accessed=bytes_accessed,
        ),
    )(inp, wmat, vec)

    next_state = out[:, :S]
    mean = out[:, S:S + L]
    logvar = out[:, S + L:S + 2 * L]
    return next_state, mean, logvar


def init_params(key, state_size=2, condi_size=2, latent_size=2, hidden=32):
    """Deterministic synthetic parameters; weights already in (in, out) layout."""
    ks = iter(jax.random.split(key, 24))
    n = lambda k, shape, s=0.2: (s * jax.random.normal(k, shape)).astype(jnp.float32)
    row = lambda k, d, s=0.05: n(k, (1, d), s)
    p = {
        # encoder
        "ew1x": n(next(ks), (state_size, hidden)),
        "ew1c": n(next(ks), (condi_size, hidden)),
        "eb1": row(next(ks), hidden),
        "eg1": 1.0 + row(next(ks), hidden, 0.1),
        "ebe1": row(next(ks), hidden),
        "ew2": n(next(ks), (hidden, hidden)),
        "eb2": row(next(ks), hidden),
        "eg2": 1.0 + row(next(ks), hidden, 0.1),
        "ebe2": row(next(ks), hidden),
        "ewm": n(next(ks), (hidden, latent_size)),
        "ebm": row(next(ks), latent_size),
        "ewv": n(next(ks), (hidden, latent_size)),
        "ebv": row(next(ks), latent_size),
        # decoder
        "dw1z": n(next(ks), (latent_size, hidden)),
        "dw1c": n(next(ks), (condi_size, hidden)),
        "db1": row(next(ks), hidden),
        "dg1": 1.0 + row(next(ks), hidden, 0.1),
        "dbe1": row(next(ks), hidden),
        "dw2": n(next(ks), (hidden, hidden)),
        "db2": row(next(ks), hidden),
        "dg2": 1.0 + row(next(ks), hidden, 0.1),
        "dbe2": row(next(ks), hidden),
        "dwo": n(next(ks), (hidden, state_size)),
        "dbo": row(next(ks), state_size),
    }
    return p


def cvae_forward_ref(x, c, eps, p, mxu_bf16=True):
    """Pure-JAX reference of the PyTorch forward (training-mode BN).

    mxu_bf16=True mirrors the kernel's bf16 MXU operands (f32 accumulation);
    mxu_bf16=False is the full-f32 semantic reference.
    """
    if mxu_bf16:
        mm = lambda a, w: jnp.dot(a.astype(jnp.bfloat16), w.astype(jnp.bfloat16),
                                  preferred_element_type=jnp.float32)
    else:
        mm = lambda a, w: jnp.dot(a, w, preferred_element_type=jnp.float32)

    def bn(h, g_, b_):
        mu = h.mean(0, keepdims=True)
        var = ((h - mu) ** 2).mean(0, keepdims=True)
        return (h - mu) / jnp.sqrt(var + BN_EPS) * g_ + b_

    leaky = lambda h: jnp.where(h > 0, h, ALPHA * h)

    xc = jnp.concatenate([x, c], axis=1)
    W1 = jnp.concatenate([p["ew1x"], p["ew1c"]], axis=0)
    h = leaky(bn(mm(xc, W1) + p["eb1"], p["eg1"], p["ebe1"]))
    h = leaky(bn(mm(h, p["ew2"]) + p["eb2"], p["eg2"], p["ebe2"]))
    mean = jnp.tanh(mm(h, p["ewm"]) + p["ebm"])
    logvar = jnp.tanh(mm(h, p["ewv"]) + p["ebv"])

    z = mean + eps * jnp.exp(0.5 * logvar)

    g = leaky(bn(mm(z, p["dw1z"]) + mm(c, p["dw1c"]) + p["db1"], p["dg1"], p["dbe1"]))
    g = leaky(bn(mm(g, p["dw2"]) + p["db2"], p["dg2"], p["dbe2"]))
    next_state = jnp.tanh(mm(g, p["dwo"]) + p["dbo"])
    return next_state, mean, logvar


if __name__ == "__main__":
    # CVAE defaults: state_size=2, condi_size=2, latent_size=2; use hidden=32, batch=8.
    B, STATE, CONDI, LATENT, HIDDEN = 8, 2, 2, 2, 32

    key = jax.random.PRNGKey(0)
    kx, kc, keps, kp = jax.random.split(key, 4)
    x = jax.random.normal(kx, (B, STATE), dtype=jnp.float32)       # next_state observation
    c = jax.random.normal(kc, (B, CONDI), dtype=jnp.float32)       # condition
    eps = jax.random.normal(keps, (B, LATENT), dtype=jnp.float32)  # reparam noise (torch.randn)

    params = init_params(kp, STATE, CONDI, LATENT, HIDDEN)

    outs = cvae_forward(x, c, eps, params)
    jax.block_until_ready(outs)

    # Tight check against a reference with identical (bf16-MXU / f32-elementwise) numerics.
    ref_bf16 = cvae_forward_ref(x, c, eps, params, mxu_bf16=True)
    for got, want in zip(outs, ref_bf16):
        np.testing.assert_allclose(np.asarray(got), np.asarray(want), rtol=2e-3, atol=2e-3)

    # Loose sanity check against the full-f32 semantic reference (bf16 MXU rounding only).
    ref_f32 = cvae_forward_ref(x, c, eps, params, mxu_bf16=False)
    for got, want in zip(outs, ref_f32):
        np.testing.assert_allclose(np.asarray(got), np.asarray(want), rtol=1e-1, atol=1e-1)

    print("KERNEL_OK")
</pallas_src>

<mosaic_0001>
module attributes {stable_mosaic.version = 11 : i64} {
  func.func @kernel(%arg0: memref<8x6xf32, #tpu.memory_space<vmem>>, %arg1: memref<144x32xbf16, #tpu.memory_space<vmem>>, %arg2: memref<13x32xf32, #tpu.memory_space<vmem>>, %arg3: memref<8x6xf32, #tpu.memory_space<vmem>>) attributes {dimension_semantics = [], scalar_prefetch = 0 : i64, scratch_operands = 0 : i64, tpu.core_type = #tpu.core_type<tc>} {
    %c0 = arith.constant 0 : index
    %c0_0 = arith.constant 0 : index
    %0 = vector.load %arg0[%c0, %c0_0] : memref<8x6xf32, #tpu.memory_space<vmem>>, vector<8x6xf32>
    %1 = vector.extract_strided_slice %0 {offsets = [0, 0], sizes = [8, 4], strides = [1, 1]} : vector<8x6xf32> to vector<8x4xf32>
    %2 = vector.extract_strided_slice %0 {offsets = [0, 2], sizes = [8, 2], strides = [1, 1]} : vector<8x6xf32> to vector<8x2xf32>
    %3 = vector.extract_strided_slice %0 {offsets = [0, 4], sizes = [8, 2], strides = [1, 1]} : vector<8x6xf32> to vector<8x2xf32>
    %c0_1 = arith.constant 0 : index
    %c0_2 = arith.constant 0 : index
    %4 = vector.load %arg2[%c0_1, %c0_2] : memref<13x32xf32, #tpu.memory_space<vmem>>, vector<13x32xf32>
    %5 = vector.extract_strided_slice %4 {offsets = [0, 0], sizes = [1, 32], strides = [1, 1]} : vector<13x32xf32> to vector<1x32xf32>
    %6 = vector.extract_strided_slice %4 {offsets = [1, 0], sizes = [1, 32], strides = [1, 1]} : vector<13x32xf32> to vector<1x32xf32>
    %7 = vector.extract_strided_slice %4 {offsets = [2, 0], sizes = [1, 32], strides = [1, 1]} : vector<13x32xf32> to vector<1x32xf32>
    %8 = vector.extract_strided_slice %4 {offsets = [3, 0], sizes = [1, 32], strides = [1, 1]} : vector<13x32xf32> to vector<1x32xf32>
    %9 = vector.extract_strided_slice %4 {offsets = [4, 0], sizes = [1, 32], strides = [1, 1]} : vector<13x32xf32> to vector<1x32xf32>
    %10 = vector.extract_strided_slice %4 {offsets = [5, 0], sizes = [1, 32], strides = [1, 1]} : vector<13x32xf32> to vector<1x32xf32>
    %11 = vector.extract_strided_slice %4 {offsets = [6, 0], sizes = [1, 32], strides = [1, 1]} : vector<13x32xf32> to vector<1x32xf32>
    %12 = vector.extract_strided_slice %4 {offsets = [7, 0], sizes = [1, 32], strides = [1, 1]} : vector<13x32xf32> to vector<1x32xf32>
    %13 = vector.extract_strided_slice %4 {offsets = [8, 0], sizes = [1, 32], strides = [1, 1]} : vector<13x32xf32> to vector<1x32xf32>
    %14 = vector.extract_strided_slice %4 {offsets = [9, 0], sizes = [1, 32], strides = [1, 1]} : vector<13x32xf32> to vector<1x32xf32>
    %15 = vector.extract_strided_slice %4 {offsets = [10, 0], sizes = [1, 32], strides = [1, 1]} : vector<13x32xf32> to vector<1x32xf32>
    %16 = vector.extract_strided_slice %4 {offsets = [11, 0], sizes = [1, 32], strides = [1, 1]} : vector<13x32xf32> to vector<1x32xf32>
    %17 = vector.extract_strided_slice %4 {offsets = [12, 0], sizes = [1, 32], strides = [1, 1]} : vector<13x32xf32> to vector<1x32xf32>
    %c0_3 = arith.constant 0 : index
    %c0_4 = arith.constant 0 : index
    %18 = vector.load %arg1[%c0_3, %c0_4] : memref<144x32xbf16, #tpu.memory_space<vmem>>, vector<4x32xbf16>
    %c16 = arith.constant 16 : index
    %c0_5 = arith.constant 0 : index
    %19 = vector.load %arg1[%c16, %c0_5] : memref<144x32xbf16, #tpu.memory_space<vmem>>, vector<32x32xbf16>
    %c48 = arith.constant 48 : index
    %c0_6 = arith.constant 0 : index
    %20 = vector.load %arg1[%c48, %c0_6] : memref<144x32xbf16, #tpu.memory_space<vmem>>, vector<2x32xbf16>
    %c64 = arith.constant 64 : index
    %c0_7 = arith.constant 0 : index
    %21 = vector.load %arg1[%c64, %c0_7] : memref<144x32xbf16, #tpu.memory_space<vmem>>, vector<2x32xbf16>
    %c80 = arith.constant 80 : index
    %c0_8 = arith.constant 0 : index
    %22 = vector.load %arg1[%c80, %c0_8] : memref<144x32xbf16, #tpu.memory_space<vmem>>, vector<32x32xbf16>
    %c112 = arith.constant 112 : index
    %c0_9 = arith.constant 0 : index
    %23 = vector.load %arg1[%c112, %c0_9] : memref<144x32xbf16, #tpu.memory_space<vmem>>, vector<32x32xbf16>
    %24 = arith.truncf %1 : vector<8x4xf32> to vector<8x4xbf16>
    %cst = arith.constant dense<0.000000e+00> : vector<8x32xf32>
    %25 = tpu.matmul %24, %18, %cst {dimension_numbers = #tpu.dot_dimension_numbers<[1], [0], [0], [1], [0, 0, 1, 1], [], []>} : vector<8x4xbf16>, vector<4x32xbf16>, vector<8x32xf32> -> vector<8x32xf32>
    %26 = vector.broadcast %5 : vector<1x32xf32> to vector<8x32xf32>
    %27 = arith.addf %25, %26 : vector<8x32xf32>
    %cst_10 = arith.constant dense<0.000000e+00> : vector<32xf32>
    %28 = vector.multi_reduction <add>, %27, %cst_10 [0] : vector<8x32xf32> to vector<32xf32>
    %29 = vector.shape_cast %28 : vector<32xf32> to vector<1x32xf32>
    %cst_11 = arith.constant 8.000000e+00 : f32
    %30 = vector.broadcast %cst_11 : f32 to vector<1x32xf32>
    %31 = arith.divf %29, %30 : vector<1x32xf32>
    %32 = vector.broadcast %31 : vector<1x32xf32> to vector<8x32xf32>
    %33 = arith.subf %27, %32 : vector<8x32xf32>
    %34 = arith.mulf %33, %33 : vector<8x32xf32>
    %cst_12 = arith.constant dense<0.000000e+00> : vector<32xf32>
    %35 = vector.multi_reduction <add>, %34, %cst_12 [0] : vector<8x32xf32> to vector<32xf32>
    %36 = vector.shape_cast %35 : vector<32xf32> to vector<1x32xf32>
    %cst_13 = arith.constant 8.000000e+00 : f32
    %37 = vector.broadcast %cst_13 : f32 to vector<1x32xf32>
    %38 = arith.divf %36, %37 : vector<1x32xf32>
    %cst_14 = arith.constant 9.99999974E-6 : f32
    %39 = vector.broadcast %cst_14 : f32 to vector<1x32xf32>
    %40 = arith.addf %38, %39 : vector<1x32xf32>
    %41 = math.rsqrt %40 : vector<1x32xf32>
    %42 = vector.broadcast %41 : vector<1x32xf32> to vector<8x32xf32>
    %43 = arith.mulf %33, %42 : vector<8x32xf32>
    %44 = vector.broadcast %6 : vector<1x32xf32> to vector<8x32xf32>
    %45 = arith.mulf %43, %44 : vector<8x32xf32>
    %46 = vector.broadcast %7 : vector<1x32xf32> to vector<8x32xf32>
    %47 = arith.addf %45, %46 : vector<8x32xf32>
    %cst_15 = arith.constant 0.000000e+00 : f32
    %48 = vector.broadcast %cst_15 : f32 to vector<8x32xf32>
    %49 = arith.cmpf ogt, %47, %48 : vector<8x32xf32>
    %cst_16 = arith.constant 0.00999999977 : f32
    %50 = vector.broadcast %cst_16 : f32 to vector<8x32xf32>
    %51 = arith.mulf %50, %47 : vector<8x32xf32>
    %52 = arith.select %49, %47, %51 : vector<8x32xi1>, vector<8x32xf32>
    %53 = arith.truncf %52 : vector<8x32xf32> to vector<8x32xbf16>
    %cst_17 = arith.constant dense<0.000000e+00> : vector<8x32xf32>
    %54 = tpu.matmul %53, %19, %cst_17 {dimension_numbers = #tpu.dot_dimension_numbers<[1], [0], [0], [1], [0, 0, 1, 1], [], []>} : vector<8x32xbf16>, vector<32x32xbf16>, vector<8x32xf32> -> vector<8x32xf32>
    %55 = vector.broadcast %8 : vector<1x32xf32> to vector<8x32xf32>
    %56 = arith.addf %54, %55 : vector<8x32xf32>
    %cst_18 = arith.constant dense<0.000000e+00> : vector<32xf32>
    %57 = vector.multi_reduction <add>, %56, %cst_18 [0] : vector<8x32xf32> to vector<32xf32>
    %58 = vector.shape_cast %57 : vector<32xf32> to vector<1x32xf32>
    %cst_19 = arith.constant 8.000000e+00 : f32
    %59 = vector.broadcast %cst_19 : f32 to vector<1x32xf32>
    %60 = arith.divf %58, %59 : vector<1x32xf32>
    %61 = vector.broadcast %60 : vector<1x32xf32> to vector<8x32xf32>
    %62 = arith.subf %56, %61 : vector<8x32xf32>
    %63 = arith.mulf %62, %62 : vector<8x32xf32>
    %cst_20 = arith.constant dense<0.000000e+00> : vector<32xf32>
    %64 = vector.multi_reduction <add>, %63, %cst_20 [0] : vector<8x32xf32> to vector<32xf32>
    %65 = vector.shape_cast %64 : vector<32xf32> to vector<1x32xf32>
    %cst_21 = arith.constant 8.000000e+00 : f32
    %66 = vector.broadcast %cst_21 : f32 to vector<1x32xf32>
    %67 = arith.divf %65, %66 : vector<1x32xf32>
    %cst_22 = arith.constant 9.99999974E-6 : f32
    %68 = vector.broadcast %cst_22 : f32 to vector<1x32xf32>
    %69 = arith.addf %67, %68 : vector<1x32xf32>
    %70 = math.rsqrt %69 : vector<1x32xf32>
    %71 = vector.broadcast %70 : vector<1x32xf32> to vector<8x32xf32>
    %72 = arith.mulf %62, %71 : vector<8x32xf32>
    %73 = vector.broadcast %9 : vector<1x32xf32> to vector<8x32xf32>
    %74 = arith.mulf %72, %73 : vector<8x32xf32>
    %75 = vector.broadcast %10 : vector<1x32xf32> to vector<8x32xf32>
    %76 = arith.addf %74, %75 : vector<8x32xf32>
    %cst_23 = arith.constant 0.000000e+00 : f32
    %77 = vector.broadcast %cst_23 : f32 to vector<8x32xf32>
    %78 = arith.cmpf ogt, %76, %77 : vector<8x32xf32>
    %cst_24 = arith.constant 0.00999999977 : f32
    %79 = vector.broadcast %cst_24 : f32 to vector<8x32xf32>
    %80 = arith.mulf %79, %76 : vector<8x32xf32>
    %81 = arith.select %78, %76, %80 : vector<8x32xi1>, vector<8x32xf32>
    %82 = arith.truncf %81 : vector<8x32xf32> to vector<8x32xbf16>
    %cst_25 = arith.constant dense<0.000000e+00> : vector<8x32xf32>
    %83 = tpu.matmul %82, %23, %cst_25 {dimension_numbers = #tpu.dot_dimension_numbers<[1], [0], [0], [1], [0, 0, 1, 1], [], []>} : vector<8x32xbf16>, vector<32x32xbf16>, vector<8x32xf32> -> vector<8x32xf32>
    %84 = vector.broadcast %17 : vector<1x32xf32> to vector<8x32xf32>
    %85 = arith.addf %83, %84 : vector<8x32xf32>
    %86 = vector.extract_strided_slice %85 {offsets = [0, 0], sizes = [8, 4], strides = [1, 1]} : vector<8x32xf32> to vector<8x4xf32>
    %87 = math.tanh %86 : vector<8x4xf32>
    %88 = vector.extract_strided_slice %87 {offsets = [0, 0], sizes = [8, 2], strides = [1, 1]} : vector<8x4xf32> to vector<8x2xf32>
    %89 = vector.extract_strided_slice %87 {offsets = [0, 2], sizes = [8, 2], strides = [1, 1]} : vector<8x4xf32> to vector<8x2xf32>
    %cst_26 = arith.constant 5.000000e-01 : f32
    %90 = vector.broadcast %cst_26 : f32 to vector<8x2xf32>
    %91 = arith.mulf %90, %89 : vector<8x2xf32>
    %92 = math.exp %91 : vector<8x2xf32>
    %93 = arith.mulf %3, %92 : vector<8x2xf32>
    %94 = arith.addf %88, %93 : vector<8x2xf32>
    %95 = arith.truncf %94 : vector<8x2xf32> to vector<8x2xbf16>
    %cst_27 = arith.constant dense<0.000000e+00> : vector<8x32xf32>
    %96 = tpu.matmul %95, %20, %cst_27 {dimension_numbers = #tpu.dot_dimension_numbers<[1], [0], [0], [1], [0, 0, 1, 1], [], []>} : vector<8x2xbf16>, vector<2x32xbf16>, vector<8x32xf32> -> vector<8x32xf32>
    %97 = arith.truncf %2 : vector<8x2xf32> to vector<8x2xbf16>
    %cst_28 = arith.constant dense<0.000000e+00> : vector<8x32xf32>
    %98 = tpu.matmul %97, %21, %cst_28 {dimension_numbers = #tpu.dot_dimension_numbers<[1], [0], [0], [1], [0, 0, 1, 1], [], []>} : vector<8x2xbf16>, vector<2x32xbf16>, vector<8x32xf32> -> vector<8x32xf32>
    %99 = arith.addf %96, %98 : vector<8x32xf32>
    %100 = vector.broadcast %11 : vector<1x32xf32> to vector<8x32xf32>
    %101 = arith.addf %99, %100 : vector<8x32xf32>
    %cst_29 = arith.constant dense<0.000000e+00> : vector<32xf32>
    %102 = vector.multi_reduction <add>, %101, %cst_29 [0] : vector<8x32xf32> to vector<32xf32>
    %103 = vector.shape_cast %102 : vector<32xf32> to vector<1x32xf32>
    %cst_30 = arith.constant 8.000000e+00 : f32
    %104 = vector.broadcast %cst_30 : f32 to vector<1x32xf32>
    %105 = arith.divf %103, %104 : vector<1x32xf32>
    %106 = vector.broadcast %105 : vector<1x32xf32> to vector<8x32xf32>
    %107 = arith.subf %101, %106 : vector<8x32xf32>
    %108 = arith.mulf %107, %107 : vector<8x32xf32>
    %cst_31 = arith.constant dense<0.000000e+00> : vector<32xf32>
    %109 = vector.multi_reduction <add>, %108, %cst_31 [0] : vector<8x32xf32> to vector<32xf32>
    %110 = vector.shape_cast %109 : vector<32xf32> to vector<1x32xf32>
    %cst_32 = arith.constant 8.000000e+00 : f32
    %111 = vector.broadcast %cst_32 : f32 to vector<1x32xf32>
    %112 = arith.divf %110, %111 : vector<1x32xf32>
    %cst_33 = arith.constant 9.99999974E-6 : f32
    %113 = vector.broadcast %cst_33 : f32 to vector<1x32xf32>
    %114 = arith.addf %112, %113 : vector<1x32xf32>
    %115 = math.rsqrt %114 : vector<1x32xf32>
    %116 = vector.broadcast %115 : vector<1x32xf32> to vector<8x32xf32>
    %117 = arith.mulf %107, %116 : vector<8x32xf32>
    %118 = vector.broadcast %12 : vector<1x32xf32> to vector<8x32xf32>
    %119 = arith.mulf %117, %118 : vector<8x32xf32>
    %120 = vector.broadcast %13 : vector<1x32xf32> to vector<8x32xf32>
    %121 = arith.addf %119, %120 : vector<8x32xf32>
    %cst_34 = arith.constant 0.000000e+00 : f32
    %122 = vector.broadcast %cst_34 : f32 to vector<8x32xf32>
    %123 = arith.cmpf ogt, %121, %122 : vector<8x32xf32>
    %cst_35 = arith.constant 0.00999999977 : f32
    %124 = vector.broadcast %cst_35 : f32 to vector<8x32xf32>
    %125 = arith.mulf %124, %121 : vector<8x32xf32>
    %126 = arith.select %123, %121, %125 : vector<8x32xi1>, vector<8x32xf32>
    %127 = arith.truncf %126 : vector<8x32xf32> to vector<8x32xbf16>
    %cst_36 = arith.constant dense<0.000000e+00> : vector<8x32xf32>
    %128 = tpu.matmul %127, %22, %cst_36 {dimension_numbers = #tpu.dot_dimension_numbers<[1], [0], [0], [1], [0, 0, 1, 1], [], []>} : vector<8x32xbf16>, vector<32x32xbf16>, vector<8x32xf32> -> vector<8x32xf32>
    %129 = vector.broadcast %14 : vector<1x32xf32> to vector<8x32xf32>
    %130 = arith.addf %128, %129 : vector<8x32xf32>
    %cst_37 = arith.constant dense<0.000000e+00> : vector<32xf32>
    %131 = vector.multi_reduction <add>, %130, %cst_37 [0] : vector<8x32xf32> to vector<32xf32>
    %132 = vector.shape_cast %131 : vector<32xf32> to vector<1x32xf32>
    %cst_38 = arith.constant 8.000000e+00 : f32
    %133 = vector.broadcast %cst_38 : f32 to vector<1x32xf32>
    %134 = arith.divf %132, %133 : vector<1x32xf32>
    %135 = vector.broadcast %134 : vector<1x32xf32> to vector<8x32xf32>
    %136 = arith.subf %130, %135 : vector<8x32xf32>
    %137 = arith.mulf %136, %136 : vector<8x32xf32>
    %cst_39 = arith.constant dense<0.000000e+00> : vector<32xf32>
    %138 = vector.multi_reduction <add>, %137, %cst_39 [0] : vector<8x32xf32> to vector<32xf32>
    %139 = vector.shape_cast %138 : vector<32xf32> to vector<1x32xf32>
    %cst_40 = arith.constant 8.000000e+00 : f32
    %140 = vector.broadcast %cst_40 : f32 to vector<1x32xf32>
    %141 = arith.divf %139, %140 : vector<1x32xf32>
    %cst_41 = arith.constant 9.99999974E-6 : f32
    %142 = vector.broadcast %cst_41 : f32 to vector<1x32xf32>
    %143 = arith.addf %141, %142 : vector<1x32xf32>
    %144 = math.rsqrt %143 : vector<1x32xf32>
    %145 = vector.broadcast %144 : vector<1x32xf32> to vector<8x32xf32>
    %146 = arith.mulf %136, %145 : vector<8x32xf32>
    %147 = vector.broadcast %15 : vector<1x32xf32> to vector<8x32xf32>
    %148 = arith.mulf %146, %147 : vector<8x32xf32>
    %149 = vector.broadcast %16 : vector<1x32xf32> to vector<8x32xf32>
    %150 = arith.addf %148, %149 : vector<8x32xf32>
    %cst_42 = arith.constant 0.000000e+00 : f32
    %151 = vector.broadcast %cst_42 : f32 to vector<8x32xf32>
    %152 = arith.cmpf ogt, %150, %151 : vector<8x32xf32>
    %cst_43 = arith.constant 0.00999999977 : f32
    %153 = vector.broadcast %cst_43 : f32 to vector<8x32xf32>
    %154 = arith.mulf %153, %150 : vector<8x32xf32>
    %155 = arith.select %152, %150, %154 : vector<8x32xi1>, vector<8x32xf32>
    %156 = arith.truncf %155 : vector<8x32xf32> to vector<8x32xbf16>
    %cst_44 = arith.constant dense<0.000000e+00> : vector<8x32xf32>
    %157 = tpu.matmul %156, %23, %cst_44 {dimension_numbers = #tpu.dot_dimension_numbers<[1], [0], [0], [1], [0, 0, 1, 1], [], []>} : vector<8x32xbf16>, vector<32x32xbf16>, vector<8x32xf32> -> vector<8x32xf32>
    %158 = vector.broadcast %17 : vector<1x32xf32> to vector<8x32xf32>
    %159 = arith.addf %157, %158 : vector<8x32xf32>
    %160 = vector.extract_strided_slice %159 {offsets = [0, 4], sizes = [8, 2], strides = [1, 1]} : vector<8x32xf32> to vector<8x2xf32>
    %161 = math.tanh %160 : vector<8x2xf32>
    %162 = tpu.concatenate %161, %87 in 1 : vector<8x2xf32>, vector<8x4xf32> -> vector<8x6xf32>
    %c0_45 = arith.constant 0 : index
    %c0_46 = arith.constant 0 : index
    %163 = vector.load %arg3[%c0_45, %c0_46] : memref<8x6xf32, #tpu.memory_space<vmem>>, vector<8x6xf32>
    tpu.vector_store %arg3[%c0_45, %c0_46], %162 {strides = array<i32>} : memref<8x6xf32, #tpu.memory_space<vmem>>, vector<8x6xf32>,
    return
  }
}

</mosaic_0001>

<bundles_post_ra>
// kernel: cvae_forward.1
= control target key start
LH: loop header
LB: loop body
LE: loop exit
PB: predicated region body
PF: predicated region fallthrough
CT: control target
= control target key end

     0   :  { %vm42_vm0 = vcmask 1041408   ;;  %v687_v0 = vmov 0.0   ;;  %vm688_vm1 = vmmov 0   ;;  %vm38_vm2 = vcmask 31744   ;;  %s689_s27 = smov 126   ;;  %s690_s4 = smov 2   ;;  %s857_s1 = inlined_call_operand.vmem [shape: bf16[144,32], index: 1, kind: input, shape index: {}]   ;;  %s858_s0 = inlined_call_operand.vmem [shape: f32[8,6], index: 0, kind: input, shape index: {}]   ;;  %s859_s2 = inlined_call_operand.vmem [shape: f32[13,32], index: 2, kind: input, shape index: {}]   ;;  %s860_s3 = inlined_call_operand.vmem [shape: f32[8,6], index: 3, kind: output, shape index: {}]  }
   0x1   :  { %612 = vmatprep.subr.bf16.mxu0 %v687_v0  ;;  %v18_v1 = vld [vmem:[%s857_s1] sm:$0x3]  ;;  %614 = vmatprep.mubr.msk.bf16.mxu0 %vm688_vm1, %v687_v0  ;;  %v667_v5 = vld [vmem:[%s857_s1 + $0x8] sm:$0xff]   ;;  %v668_v6 = vld [vmem:[%s857_s1 + $0x10] sm:$0xff]   ;;  %v34_v7 = vlaneseq  ;;  %vm86_vm3 = vcmask 261120   ;;  %vm298_vm6 = vcmask 1040384  }
   0x2   :  { %v721_v2 = vld [vmem:[%s858_s0] sm:$0xff]  ;;  %v44_v3 = vsel %vm42_vm0, %v18_v1, 0  ;;  %618 = vmatprep.subr.bf16.mxu1 %v687_v0  ;;  %622 = vmatprep.mubr.msk.bf16.mxu1 %vm688_vm1, %v687_v0  ;;  %v769_v47 = vld [vmem:[%s857_s1 + $0x38] sm:$0xff]   ;;  %vm294_vm7 = vcmask 15360   ;;  %s691_s5 = smov 124   ;;  %vm575_vm10 = vcmask 48128  }
   0x3   :  { %v725_v4 = vpack.c.bf16 %v721_v2, %v721_v2  ;;  %613 = vmatpush3.bf16.msra.mxu0 %v44_v3  ;;  %619 = vmatpush3.bf16.msra.mxu1 %v667_v5  ;;  %v742_v8 = vshrl.u32 %v34_v7, 7  ;;  %v748_v10 = vld [vmem:[%s859_s2] sm:$0xff] }
   0x4   :  { %626 = vmatprep.subr.bf16.mxu0 %v687_v0  ;;  %620 = vmatprep.subr.bf16.mxu1 %v687_v0  ;;  %v776_v48 = vld [vmem:[%s857_s1 + $0x40] sm:$0xff]  }
   0x5   :  { %v36_v9 = vsub.s32 0, %v742_v8  ;;  %v111_v36 = vsub.s32 1, %v742_v8  ;;  %v116_v37 = vsub.s32 2, %v742_v8  ;;  %v125_v49 = vsub.s32 3, %v742_v8  ;;  %292 = vrot.lane.b32.xlu1 %v725_v4, %s689_s27 }
   0x6   :  { %615 = vmatmul.mubr.msk.bf16.vlgmr.msra.gmra.mrb[0].mxu0 %vm38_vm2, %v725_v4 }
   0x7   :  { %630 = vmatprep.mubr.msk.bf16.mxu0 %vm688_vm1, %v687_v0  ;;  %621 = vmatpush3.bf16.msra.mxu1 %v668_v6  ;;  %v37_v11 = vrot.slane %v748_v10, %v36_v9  ;;  %v112_v38 = vrot.slane %v748_v10, %v111_v36  ;;  %v117_v41 = vrot.slane %v748_v10, %v116_v37 }
   0x8   :  { %634 = vmatprep.subr.bf16.mxu1 %v687_v0  ;;  %627 = vmatpush3.bf16.msra.mxu0 %v769_v47  ;;  %v126_v50 = vrot.slane %v748_v10, %v125_v49 }
   0x9   :  { %628 = vmatprep.subr.bf16.mxu0 %v687_v0 }
   0xc   :  { %629 = vmatpush3.bf16.msra.mxu0 %v776_v48 }
   0xd   :  { %640 = vmatprep.subr.bf16.mxu0 %v687_v0 }
  0x77   :  { %v293_v4 = vpop.permute.xlu1 %292 }
  0xd9   :  { %v80_v12 = vpop.f32.mrb[0].mxu0 }
  0xda   :  { %v81_v13 = vadd.f32 %v80_v12, %v37_v11  ;;  %v616_v14 = vpop.f32.mrb[1].mxu0 }
  0xdb   :  { %v83_v15 = vpop.f32.mrb[2].mxu0 }
  0xdc   :  { %v87_v16 = vsel %vm86_vm3, %v81_v13, 0.0  ;;  %v617_v17 = vpop.f32.mrb[3].mxu0 }
  0xdd   :  { %v88_v18 = vrot.slane %v87_v16, 4  ;;  %v205_v17 = vsub.s32 4, %v742_v8 }
  0xdf   :  { %v89_v19 = vadd.f32 %v88_v18, %v87_v16  ;;  %v210_v18 = vsub.s32 5, %v742_v8 }
  0xe1   :  { %v90_v20 = vrot.slane %v89_v19, 2 }
  0xe3   :  { %v91_v21 = vadd.f32 %v90_v20, %v89_v19  ;;  %v206_v19 = vrot.slane %v748_v10, %v205_v17 }
  0xe5   :  { %v92_v22 = vrot.slane %v91_v21, 1 }
  0xe7   :  { %v93_v23 = vadd.f32 %v92_v22, %v91_v21  ;;  %v211_v22 = vrot.slane %v748_v10, %v210_v18 }
  0xe9   :  { %v95_v24 = vmul.f32 0.125, %v93_v23 }
  0xeb   :  { %v96_v25 = vsub.f32 %v81_v13, %v95_v24 }
  0xed   :  { %v97_v26 = vmul.f32 %v96_v25, %v96_v25 }
  0xef   :  { %v98_v27 = vsel %vm86_vm3, %v97_v26, 0.0 }
  0xf0   :  { %v99_v28 = vrot.slane %v98_v27, 4 }
  0xf2   :  { %v100_v29 = vadd.f32 %v99_v28, %v98_v27  ;;  %v796_v28 = vld [vmem:[%s859_s2 + $0x8] sm:$0x1f] }
  0xf4   :  { %v101_v30 = vrot.slane %v100_v29, 2 }
  0xf6   :  { %v102_v31 = vadd.f32 %v101_v30, %v100_v29  ;;  %v799_v29 = vrot.slane %v796_v28, %v205_v17 }
  0xf8   :  { %v103_v32 = vrot.slane %v102_v31, 1 }
  0xfa   :  { %v104_v33 = vadd.f32 %v103_v32, %v102_v31 }
  0xfc   :  { %v105_v34 = vmul.f32 0.125, %v104_v33 }
  0xfe   :  { %v106_v35 = vadd.f32 1e-05, %v105_v34 }
 0x100   :  { %673 = vrsqrt.f32 %v106_v35 }
 0x10a   :  { %v674_v39 = vpop.eup %673 }
 0x10b   :  { %v108_v40 = vmul.f32 %v674_v39, %v96_v25 }
 0x10d   :  { %v113_v42 = vmul.f32 %v112_v38, %v108_v40  ;;  %v24_v40 = vld [vmem:[%s857_s1 + $0x20] sm:$0x1] }
 0x10f   :  { %v118_v43 = vadd.f32 %v117_v41, %v113_v42  ;;  %v23_v41 = vld [vmem:[%s857_s1 + $0x18] sm:$0x1]  ;;  %v300_v42 = vsel %vm298_vm6, %v24_v40, 0 }
 0x111   :  { %vm119_vm4 = vcmp.gt.f32.partialorder %v118_v43, 0.0  ;;  %v120_v44 = vmul.f32 0.01, %v118_v43 }
 0x113   :  { %v121_v45 = vsel %vm119_vm4, %v118_v43, %v120_v44  ;;  %v346_v43 = vsel %vm298_vm6, %v23_v41, 0 }
 0x114   :  { %v122_v46 = vpack.c.bf16 %v121_v45, %v121_v45 }
 0x116   :  { %623 = vmatmul.mubr.msk.bf16.vlgmr.msra.gmra.mrb[0].mxu1 %vm86_vm3, %v122_v46 }
 0x117   :  { %636 = vmatprep.mubr.msk.bf16.mxu1 %vm688_vm1, %v687_v0  ;;  %635 = vmatpush3.bf16.msra.mxu1 %v300_v42 }
 0x118   :  { %646 = vmatprep.subr.bf16.mxu1 %v687_v0 }
 0x11e   :  { %637 = vmatmul.mubr.msk.bf16.vlgmr.msra.gmra.mrb[4].mxu1 %vm294_vm7, %v293_v4 }
 0x11f   :  { %650 = vmatprep.mubr.msk.bf16.mxu1 %vm688_vm1, %v687_v0 }
 0x1e9   :  { %v176_v51 = vpop.f32.mrb[0].mxu1 }
 0x1ea   :  { %v177_v52 = vadd.f32 %v176_v51, %v126_v50  ;;  %v624_v53 = vpop.f32.mrb[1].mxu1 }
 0x1eb   :  { %v179_v54 = vpop.f32.mrb[2].mxu1 }
 0x1ec   :  { %v182_v55 = vsel %vm86_vm3, %v177_v52, 0.0  ;;  %v625_v56 = vpop.f32.mrb[3].mxu1 }
 0x1ed   :  { %v183_v57 = vrot.slane %v182_v55, 4  ;;  %v671_v56 = vld [vmem:[%s857_s1 + $0x28] sm:$0xff]  }
 0x1ee   :  { %647 = vmatpush3.bf16.msra.mxu1 %v671_v56 }
 0x1ef   :  { %v184_v58 = vadd.f32 %v183_v57, %v182_v55  ;;  %648 = vmatprep.subr.bf16.mxu1 %v687_v0  ;;  %v390_v57 = vsub.s32 6, %v742_v8 }
 0x1f1   :  { %v185_v59 = vrot.slane %v184_v58, 2  ;;  %v336_v53 = vpop.f32.mrb[4].mxu1 }
 0x1f3   :  { %v186_v60 = vadd.f32 %v185_v59, %v184_v58 }
 0x1f5   :  { %v187_v61 = vrot.slane %v186_v60, 1 }
 0x1f7   :  { %v188_v62 = vadd.f32 %v187_v61, %v186_v60 }
 0x1f9   :  { %v189_v63 = vmul.f32 0.125, %v188_v62 }
 0x1fb   :  { %v190_v1 = vsub.f32 %v177_v52, %v189_v63 }
 0x1fd   :  { %v191_v3 = vmul.f32 %v190_v1, %v190_v1 }
 0x1ff   :  { %v192_v5 = vsel %vm86_vm3, %v191_v3, 0.0 }
 0x200   :  { %v193_v6 = vrot.slane %v192_v5, 4 }
 0x202   :  { %v194_v7 = vadd.f32 %v193_v6, %v192_v5 }
 0x204   :  { %v195_v11 = vrot.slane %v194_v7, 2 }
 0x206   :  { %v196_v12 = vadd.f32 %v195_v11, %v194_v7 }
 0x208   :  { %v197_v13 = vrot.slane %v196_v12, 1 }
 0x20a   :  { %v198_v14 = vadd.f32 %v197_v13, %v196_v12 }
 0x20c   :  { %v199_v15 = vmul.f32 0.125, %v198_v14 }
 0x20e   :  { %v200_v16 = vadd.f32 1e-05, %v199_v15 }
 0x210   :  { %675 = vrsqrt.f32 %v200_v16 }
 0x21a   :  { %v676_v20 = vpop.eup %675 }
 0x21b   :  { %v202_v21 = vmul.f32 %v676_v20, %v190_v1 }
 0x21d   :  { %v207_v23 = vmul.f32 %v206_v19, %v202_v21 }
 0x21f   :  { %v212_v24 = vadd.f32 %v211_v22, %v207_v23 }
 0x221   :  { %vm213_vm5 = vcmp.gt.f32.partialorder %v212_v24, 0.0  ;;  %v214_v25 = vmul.f32 0.01, %v212_v24 }
 0x223   :  { %v215_v26 = vsel %vm213_vm5, %v212_v24, %v214_v25  ;;  %v416_v24 = vsub.s32 7, %v742_v8 }
 0x224   :  { %v216_v27 = vpack.c.bf16 %v215_v26, %v215_v26 }
 0x225   :  { %v417_v25 = vrot.slane %v748_v10, %v416_v24 }
 0x226   :  { %631 = vmatmul.mubr.msk.bf16.vlgmr.msra.gmra.mrb[4].mxu0 %vm86_vm3, %v216_v27  ;;  %v422_v27 = vrot.slane %v796_v28, %v36_v9 }
 0x227   :  { %642 = vmatprep.mubr.msk.bf16.mxu0 %vm688_vm1, %v687_v0  ;;  %641 = vmatpush3.bf16.msra.mxu0 %v346_v43 }
 0x228   :  { %654 = vmatprep.subr.bf16.mxu0 %v687_v0 }
 0x2f9   :  { %v270_v30 = vpop.f32.mrb[4].mxu0 }
 0x2fa   :  { %v271_v31 = vadd.f32 %v270_v30, %v799_v29  ;;  %v632_v32 = vpop.f32.mrb[5].mxu0 }
 0x2fb   :  { %v273_v33 = vpop.f32.mrb[6].mxu0 }
 0x2fc   :  { %677 = vtanh.f32 %v271_v31  ;;  %v633_v34 = vpop.f32.mrb[7].mxu0 }
 0x306   :  { %v678_v35 = vpop.eup %677 }
 0x307   :  { %v277_v38 = vmul.f32 0.5, %v678_v35 }
 0x309   :  { %v278_v39 = vmul.f32 1.442695, %v277_v38  ;;  %v431_v38 = vrot.slane %v796_v28, %v111_v36 }
 0x30b   :  { %679 = vpow2.f32 %v278_v39 }
 0x315   :  { %v680_v44 = vpop.eup %679 }
 0x316   :  { %281 = vrot.lane.b32.xlu0 %v680_v44, %s690_s4 }
 0x388   :  { %v282_v45 = vpop.permute.xlu0 %281 }
 0x389   :  { %v284_v46 = vmul.f32 %v282_v45, %v721_v2  ;;  %v638_v2 = vpop.f32.mrb[5].mxu1 }
 0x38a   :  { %v339_v54 = vpop.f32.mrb[6].mxu1 }
 0x38b   :  { %286 = vrot.lane.b32.xlu0 %v284_v46, %s691_s5  ;;  %v639_v55 = vpop.f32.mrb[7].mxu1 }
 0x38f   :  { %571 = vrot.lane.b32.xlu0 %v678_v35, %s690_s4 }
 0x3fd   :  { %v287_v50 = vpop.permute.xlu0 %286 }
 0x3fe   :  { %v289_v51 = vadd.f32 %v678_v35, %v287_v50 }
 0x400   :  { %v290_v52 = vpack.c.bf16 %v289_v51, %v289_v51 }
 0x401   :  { %v572_v8 = vpop.permute.xlu0 %571 }
 0x402   :  { %643 = vmatmul.mubr.msk.bf16.vlgmr.msra.gmra.mrb[8].mxu0 %vm294_vm7, %v290_v52 }
 0x403   :  { %655 = vmatpush3.bf16.msra.mxu0 %v769_v47  ;;  %658 = vmatprep.mubr.msk.bf16.mxu0 %vm688_vm1, %v687_v0  ;;  %v672_v47 = vld [vmem:[%s857_s1 + $0x30] sm:$0xff]  }
 0x404   :  { %656 = vmatprep.subr.bf16.mxu0 %v687_v0  ;;  %649 = vmatpush3.bf16.msra.mxu1 %v672_v47 }
 0x407   :  { %657 = vmatpush3.bf16.msra.mxu0 %v776_v48  ;;  %v391_v48 = vrot.slane %v748_v10, %v390_v57 }
 0x4d5   :  { %v382_v58 = vpop.f32.mrb[8].mxu0 }
 0x4d6   :  { %v383_v59 = vadd.f32 %v382_v58, %v336_v53  ;;  %v644_v60 = vpop.f32.mrb[9].mxu0 }
 0x4d7   :  { %v385_v61 = vpop.f32.mrb[10].mxu0 }
 0x4d8   :  { %v392_v62 = vadd.f32 %v391_v48, %v383_v59  ;;  %v645_v63 = vpop.f32.mrb[11].mxu0  ;;  %v511_v59 = vrot.slane %v796_v28, %v116_v37  ;;  %v516_v61 = vrot.slane %v796_v28, %v125_v49 }
 0x4da   :  { %v393_v1 = vsel %vm86_vm3, %v392_v62, 0.0 }
 0x4db   :  { %v394_v3 = vrot.slane %v393_v1, 4 }
 0x4dd   :  { %v395_v5 = vadd.f32 %v394_v3, %v393_v1 }
 0x4df   :  { %v396_v0 = vrot.slane %v395_v5, 2 }
 0x4e1   :  { %v397_v6 = vadd.f32 %v396_v0, %v395_v5 }
 0x4e3   :  { %v398_v7 = vrot.slane %v397_v6, 1 }
 0x4e5   :  { %v399_v11 = vadd.f32 %v398_v7, %v397_v6 }
 0x4e7   :  { %v400_v12 = vmul.f32 0.125, %v399_v11 }
 0x4e9   :  { %v401_v13 = vsub.f32 %v392_v62, %v400_v12 }
 0x4eb   :  { %v402_v14 = vmul.f32 %v401_v13, %v401_v13 }
 0x4ed   :  { %v403_v15 = vsel %vm86_vm3, %v402_v14, 0.0 }
 0x4ee   :  { %v404_v16 = vrot.slane %v403_v15, 4 }
 0x4f0   :  { %v405_v17 = vadd.f32 %v404_v16, %v403_v15 }
 0x4f2   :  { %v406_v18 = vrot.slane %v405_v17, 2 }
 0x4f4   :  { %v407_v19 = vadd.f32 %v406_v18, %v405_v17 }
 0x4f6   :  { %v408_v20 = vrot.slane %v407_v19, 1 }
 0x4f8   :  { %v409_v21 = vadd.f32 %v408_v20, %v407_v19 }
 0x4fa   :  { %v410_v22 = vmul.f32 0.125, %v409_v21 }
 0x4fc   :  { %v411_v23 = vadd.f32 1e-05, %v410_v22 }
 0x4fe   :  { %681 = vrsqrt.f32 %v411_v23 }
 0x508   :  { %v682_v26 = vpop.eup %681 }
 0x509   :  { %v413_v30 = vmul.f32 %v682_v26, %v401_v13 }
 0x50b   :  { %v418_v31 = vmul.f32 %v417_v25, %v413_v30 }
 0x50d   :  { %v423_v32 = vadd.f32 %v422_v27, %v418_v31 }
 0x50f   :  { %v425_v33 = vmul.f32 0.01, %v423_v32  ;;  %vm424_vm8 = vcmp.gt.f32.partialorder %v423_v32, 0.0 }
 0x511   :  { %v426_v34 = vsel %vm424_vm8, %v423_v32, %v425_v33 }
 0x512   :  { %v427_v35 = vpack.c.bf16 %v426_v34, %v426_v34 }
 0x514   :  { %651 = vmatmul.mubr.msk.bf16.vlgmr.msra.gmra.mrb[8].mxu1 %vm86_vm3, %v427_v35 }
 0x5e7   :  { %v481_v39 = vpop.f32.mrb[8].mxu1 }
 0x5e8   :  { %v482_v10 = vadd.f32 %v481_v39, %v431_v38  ;;  %v652_v40 = vpop.f32.mrb[9].mxu1 }
 0x5e9   :  { %v484_v41 = vpop.f32.mrb[10].mxu1 }
 0x5ea   :  { %v487_v42 = vsel %vm86_vm3, %v482_v10, 0.0  ;;  %v653_v9 = vpop.f32.mrb[11].mxu1 }
 0x5eb   :  { %v488_v43 = vrot.slane %v487_v42, 4 }
 0x5ed   :  { %v489_v44 = vadd.f32 %v488_v43, %v487_v42 }
 0x5ef   :  { %v490_v4 = vrot.slane %v489_v44, 2 }
 0x5f1   :  { %v491_v45 = vadd.f32 %v490_v4, %v489_v44 }
 0x5f3   :  { %v492_v46 = vrot.slane %v491_v45, 1 }
 0x5f5   :  { %v493_v50 = vadd.f32 %v492_v46, %v491_v45 }
 0x5f7   :  { %v494_v51 = vmul.f32 0.125, %v493_v50 }
 0x5f9   :  { %v495_v52 = vsub.f32 %v482_v10, %v494_v51 }
 0x5fb   :  { %v496_v53 = vmul.f32 %v495_v52, %v495_v52 }
 0x5fd   :  { %v497_v2 = vsel %vm86_vm3, %v496_v53, 0.0 }
 0x5fe   :  { %v498_v54 = vrot.slane %v497_v2, 4 }
 0x600   :  { %v499_v36 = vadd.f32 %v498_v54, %v497_v2 }
 0x602   :  { %v500_v55 = vrot.slane %v499_v36, 2 }
 0x604   :  { %v501_v56 = vadd.f32 %v500_v55, %v499_v36 }
 0x606   :  { %v502_v47 = vrot.slane %v501_v56, 1 }
 0x608   :  { %v503_v57 = vadd.f32 %v502_v47, %v501_v56 }
 0x60a   :  { %v504_v48 = vmul.f32 0.125, %v503_v57 }
 0x60c   :  { %v505_v58 = vadd.f32 1e-05, %v504_v48 }
 0x60e   :  { %683 = vrsqrt.f32 %v505_v58 }
 0x618   :  { %v684_v60 = vpop.eup %683 }
 0x619   :  { %v507_v62 = vmul.f32 %v684_v60, %v495_v52 }
 0x61b   :  { %v512_v63 = vmul.f32 %v511_v59, %v507_v62 }
 0x61d   :  { %v517_v1 = vadd.f32 %v516_v61, %v512_v63 }
 0x61f   :  { %vm518_vm9 = vcmp.gt.f32.partialorder %v517_v1, 0.0  ;;  %v519_v3 = vmul.f32 0.01, %v517_v1 }
 0x621   :  { %v520_v5 = vsel %vm518_vm9, %v517_v1, %v519_v3 }
 0x622   :  { %v521_v0 = vpack.c.bf16 %v520_v5, %v520_v5 }
 0x624   :  { %659 = vmatmul.mubr.msk.bf16.vlgmr.msra.gmra.mrb[12].mxu0 %vm86_vm3, %v521_v0 }
 0x6f7   :  { %v559_v6 = vpop.f32.mrb[12].mxu0 }
 0x6f8   :  { %v560_v7 = vadd.f32 %v559_v6, %v799_v29  ;;  %v660_v11 = vpop.f32.mrb[13].mxu0 }
 0x6f9   :  { %v562_v12 = vpop.f32.mrb[14].mxu0 }
 0x6fa   :  { %685 = vtanh.f32 %v560_v7  ;;  %v661_v37 = vpop.f32.mrb[15].mxu0 }
 0x704   :  { %v686_v13 = vpop.eup %685 }
 0x705   :  { %567 = vrot.lane.b32.xlu1 %v686_v13, %s691_s5 }
 0x777   :  { %v568_v49 = vpop.permute.xlu1 %567 }
 0x778   :  { %v574_v28 = vsel %vm294_vm7, %v568_v49, %v572_v8 }
 0x779   :  { %576 = vst.msk [vmem:[%s860_s3] sm:$0xff] %vm575_vm10, %v574_v28 }

</bundles_post_ra>
